<compile_context>
chip_gen: v6e
topology: v6e:2x2x1
jax: 0.10.0
libtpu: 0.0.40
codegen_flags: <defaults>
</compile_context>

<pallas_src>
import functools

import jax
import jax.numpy as jnp
from jax import lax
from jax.experimental import pallas as pl
from jax.experimental.pallas import tpu as pltpu


def _pick_s_block(S, max_block=512):
    """Largest multiple-of-8 divisor of S up to max_block, else the full S."""
    if S % 8 != 0:
        return S
    best = 8
    for ts in range(8, min(S, max_block) + 1, 8):
        if S % ts == 0:
            best = ts
    return best


def _ntxent_kernel(temp_ref, emb_i_ref, emb_j_ref, loss_ref, z_ref,
                   *, batch, seq_len, mxu_dtype):
    """Grid axis 0 tiles the sequence dim.

    temp_ref  : SMEM (1,) f32       temperature
    emb_*_ref : VMEM (B, tS, H)     input blocks (native dtype, cast on load)
    loss_ref  : SMEM (1,) f32       scalar output (written on the last step)
    z_ref     : VMEM (2B, H) f32    scratch: running sum over S, persists
                                    across grid steps.
    """
    s = pl.program_id(0)
    n_s = pl.num_programs(0)
    B = batch
    n2 = 2 * B

    @pl.when(s == 0)
    def _init():
        z_ref[...] = jnp.zeros_like(z_ref)

    # Partial sums over this sequence block; the DMA for block s+1 overlaps
    # this compute.  Writing into the two halves of z_ref avoids a later
    # (2B, H) concatenate (and its layout shuffle).
    z_ref[0:B, :] += jnp.sum(emb_i_ref[...].astype(jnp.float32), axis=1)
    z_ref[B:n2, :] += jnp.sum(emb_j_ref[...].astype(jnp.float32), axis=1)

    @pl.when(s == n_s - 1)
    def _finalize():
        inv_t = 1.0 / temp_ref[0]

        # mean over S, then F.normalize(dim=1): x * rsqrt(max(||x||^2, eps^2))
        z = z_ref[...] * (1.0 / seq_len)                       # (2B, H) f32
        sumsq = jnp.sum(z * z, axis=-1, keepdims=True)
        z = z * lax.rsqrt(jnp.maximum(sumsq, 1e-24))

        z_i = z[0:B, :]
        z_j = z[B:n2, :]

        # positives: sim[k, k+B] = <z_i[k], z_j[k]>  (O(B*H), no diag extraction)
        pos_sum = jnp.sum(z_i * z_j)

        # Gram matrix on the MXU (optionally bf16 operands, f32 accumulation).
        zm = z.astype(mxu_dtype)
        sim = lax.dot_general(
            zm, zm,
            dimension_numbers=(((1,), (1,)), ((), ())),
            preferred_element_type=jnp.float32,
        )                                                      # (2B, 2B)

        # Shifted exponent: sim <= 1 so every argument is <= 0 (no overflow for
        # tiny temperatures).  The diagonal term becomes exp(0) = 1, so the
        # negatives mask reduces to subtracting the constant 1.0 -- no iota
        # matrices, no where/select pass over the (2B, 2B) tile.
        e = jnp.exp((sim - 1.0) * inv_t)
        denom = jnp.sum(e, axis=1, keepdims=True) - 1.0        # (2B, 1)

        # sum_k -log(exp(pos_k/t) / denom_orig_k)
        #   = sum_k log(denom_k) + inv_t * (2B - 2 * sum_k <z_i[k], z_j[k]>)
        total = jnp.sum(jnp.log(denom)) + inv_t * (n2 - 2.0 * pos_sum)
        loss_ref[0] = total / n2


def contrastive_loss(emb_i, emb_j, temperature=0.5, *, s_block=None,
                     mxu_dtype=jnp.float32):
    """Pallas implementation of ContrastiveLoss.forward. Returns a scalar f32.

    mxu_dtype=jnp.bfloat16 hits the fast MXU path on v6e/v7x (f32 accumulation
    is kept either way) at a small precision cost in the Gram matrix.
    """
    B, S, H = emb_i.shape
    assert emb_j.shape == (B, S, H)
    n2 = 2 * B
    if s_block is None:
        s_block = _pick_s_block(S)
    assert S % s_block == 0, (S, s_block)
    n_s = S // s_block

    temp = jnp.array([temperature], dtype=jnp.float32)

    kernel = functools.partial(_ntxent_kernel, batch=B, seq_len=S,
                               mxu_dtype=mxu_dtype)

    elem = jnp.dtype(emb_i.dtype).itemsize
    cost = pl.CostEstimate(
        flops=2 * n2 * n2 * H           # Gram matmul
        + 4 * B * S * H                  # S-sum accumulation (both inputs)
        + 8 * n2 * H,                    # mean / normalize / positives / exp-arg
        transcendentals=n2 * n2 + 2 * n2,   # exp(sim) + per-row log/rsqrt
        bytes_accessed=2 * B * S * H * elem + 8,
    )

    out = pl.pallas_call(
        kernel,
        out_shape=jax.ShapeDtypeStruct((1,), jnp.float32),
        grid=(n_s,),
        in_specs=[
            pl.BlockSpec(memory_space=pltpu.MemorySpace.SMEM),     # temperature
            pl.BlockSpec((B, s_block, H), lambda s: (0, s, 0)),    # emb_i block
            pl.BlockSpec((B, s_block, H), lambda s: (0, s, 0)),    # emb_j block
        ],
        out_specs=pl.BlockSpec(memory_space=pltpu.MemorySpace.SMEM),
        scratch_shapes=[pltpu.VMEM((n2, H), jnp.float32)],
        compiler_params=pltpu.CompilerParams(
            dimension_semantics=("arbitrary",),     # S is a reduction axis
            vmem_limit_bytes=64 * 1024 * 1024,
        ),
        cost_estimate=cost,
    )(temp, emb_i, emb_j)
    return out[0]


def contrastive_loss_ref(emb_i, emb_j, temperature=0.5):
    """Pure-JAX reference mirroring the PyTorch forward, for validation."""
    B = emb_i.shape[0]
    n2 = 2 * B
    ei = jnp.mean(emb_i.astype(jnp.float32), axis=1)
    ej = jnp.mean(emb_j.astype(jnp.float32), axis=1)
    z_i = ei / jnp.maximum(jnp.linalg.norm(ei, axis=1, keepdims=True), 1e-12)
    z_j = ej / jnp.maximum(jnp.linalg.norm(ej, axis=1, keepdims=True), 1e-12)
    z = jnp.concatenate([z_i, z_j], axis=0)
    sim = z @ z.T
    sim_ij = jnp.diagonal(sim, offset=B)
    sim_ji = jnp.diagonal(sim, offset=-B)
    positives = jnp.concatenate([sim_ij, sim_ji], axis=0)
    mask = 1.0 - jnp.eye(n2, dtype=jnp.float32)
    nominator = jnp.exp(positives / temperature)
    denominator = jnp.sum(mask * jnp.exp(sim / temperature), axis=1)
    return jnp.sum(-jnp.log(nominator / denominator)) / n2


if __name__ == "__main__":
    key = jax.random.PRNGKey(0)
    k1, k2 = jax.random.split(key)

    # args.batch_size = 2
    batch, seq, hidden = 2, 8, 32
    emb_i = jax.random.normal(k1, (batch, seq, hidden), dtype=jnp.float32)
    emb_j = jax.random.normal(k2, (batch, seq, hidden), dtype=jnp.float32)

    loss = jax.block_until_ready(contrastive_loss(emb_i, emb_j, temperature=0.5))
    loss_ref = jax.block_until_ready(
        contrastive_loss_ref(emb_i, emb_j, temperature=0.5))
    assert jnp.isfinite(loss), f"non-finite loss: {loss}"
    assert jnp.allclose(loss, loss_ref, rtol=1e-5, atol=1e-5), (loss, loss_ref)

    # Exercise the multi-step S-gridded path (4 pipelined sequence blocks).
    seq2 = 32
    k3, k4 = jax.random.split(k2)
    emb_i2 = jax.random.normal(k3, (batch, seq2, hidden), dtype=jnp.float32)
    emb_j2 = jax.random.normal(k4, (batch, seq2, hidden), dtype=jnp.float32)
    loss2 = jax.block_until_ready(
        contrastive_loss(emb_i2, emb_j2, temperature=0.5, s_block=8))
    loss2_ref = jax.block_until_ready(
        contrastive_loss_ref(emb_i2, emb_j2, temperature=0.5))
    assert jnp.allclose(loss2, loss2_ref, rtol=1e-5, atol=1e-5), (loss2, loss2_ref)

    print("KERNEL_OK")
</pallas_src>

<mosaic_0001>
module attributes {stable_mosaic.version = 11 : i64} {
  func.func @_ntxent_kernel(%arg0: i32, %arg1: memref<1xf32, #tpu.memory_space<smem>>, %arg2: memref<2x8x32xf32, #tpu.memory_space<vmem>>, %arg3: memref<2x8x32xf32, #tpu.memory_space<vmem>>, %arg4: memref<1xf32, #tpu.memory_space<smem>>, %arg5: memref<4x32xf32, #tpu.memory_space<vmem>>) attributes {dimension_semantics = [#tpu.dimension_semantics<arbitrary>], iteration_bounds = array<i64: 1>, scalar_prefetch = 0 : i64, scratch_operands = 1 : i64, tpu.core_type = #tpu.core_type<tc>, window_params = [{transform_indices = @transform_0, window_bounds = array<i64: 1>}, {transform_indices = @transform_1, window_bounds = array<i64: 2, 8, 32>}, {transform_indices = @transform_2, window_bounds = array<i64: 2, 8, 32>}, {transform_indices = @transform_3, window_bounds = array<i64: 1>}]} {
    %c0_i32 = arith.constant 0 : i32
    %0 = arith.cmpi eq, %arg0, %c0_i32 : i32
    %1 = arith.extui %0 : i1 to i32
    %c0_i32_0 = arith.constant 0 : i32
    %2 = arith.cmpi ne, %1, %c0_i32_0 : i32
    scf.if %2 {
      %cst_16 = arith.constant 0.000000e+00 : f32
      %16 = vector.broadcast %cst_16 : f32 to vector<4x32xf32>
      %c0_17 = arith.constant 0 : index
      %c0_18 = arith.constant 0 : index
      %17 = vector.load %arg5[%c0_17, %c0_18] : memref<4x32xf32, #tpu.memory_space<vmem>>, vector<4x32xf32>
      tpu.vector_store %arg5[%c0_17, %c0_18], %16 {strides = array<i32>} : memref<4x32xf32, #tpu.memory_space<vmem>>, vector<4x32xf32>,
    } else {
    }
    %c0 = arith.constant 0 : index
    %c0_1 = arith.constant 0 : index
    %3 = vector.load %arg5[%c0, %c0_1] : memref<4x32xf32, #tpu.memory_space<vmem>>, vector<2x32xf32>
    %c0_2 = arith.constant 0 : index
    %c0_3 = arith.constant 0 : index
    %c0_4 = arith.constant 0 : index
    %4 = vector.load %arg2[%c0_2, %c0_3, %c0_4] : memref<2x8x32xf32, #tpu.memory_space<vmem>>, vector<2x8x32xf32>
    %cst = arith.constant dense<0.000000e+00> : vector<2x32xf32>
    %5 = vector.multi_reduction <add>, %4, %cst [1] : vector<2x8x32xf32> to vector<2x32xf32>
    %6 = arith.addf %3, %5 : vector<2x32xf32>
    %c0_5 = arith.constant 0 : index
    %c0_6 = arith.constant 0 : index
    %7 = vector.load %arg5[%c0_5, %c0_6] : memref<4x32xf32, #tpu.memory_space<vmem>>, vector<2x32xf32>
    tpu.vector_store %arg5[%c0_5, %c0_6], %6 {strides = array<i32>} : memref<4x32xf32, #tpu.memory_space<vmem>>, vector<2x32xf32>,
    %c2 = arith.constant 2 : index
    %c0_7 = arith.constant 0 : index
    %8 = vector.load %arg5[%c2, %c0_7] : memref<4x32xf32, #tpu.memory_space<vmem>>, vector<2x32xf32>
    %c0_8 = arith.constant 0 : index
    %c0_9 = arith.constant 0 : index
    %c0_10 = arith.constant 0 : index
    %9 = vector.load %arg3[%c0_8, %c0_9, %c0_10] : memref<2x8x32xf32, #tpu.memory_space<vmem>>, vector<2x8x32xf32>
    %cst_11 = arith.constant dense<0.000000e+00> : vector<2x32xf32>
    %10 = vector.multi_reduction <add>, %9, %cst_11 [1] : vector<2x8x32xf32> to vector<2x32xf32>
    %11 = arith.addf %8, %10 : vector<2x32xf32>
    %c2_12 = arith.constant 2 : index
    %c0_13 = arith.constant 0 : index
    %12 = vector.load %arg5[%c2_12, %c0_13] : memref<4x32xf32, #tpu.memory_space<vmem>>, vector<2x32xf32>
    tpu.vector_store %arg5[%c2_12, %c0_13], %11 {strides = array<i32>} : memref<4x32xf32, #tpu.memory_space<vmem>>, vector<2x32xf32>,
    %c0_i32_14 = arith.constant 0 : i32
    %13 = arith.cmpi eq, %arg0, %c0_i32_14 : i32
    %14 = arith.extui %13 : i1 to i32
    %c0_i32_15 = arith.constant 0 : i32
    %15 = arith.cmpi ne, %14, %c0_i32_15 : i32
    scf.if %15 {
      %c0_16 = arith.constant 0 : index
      %16 = memref.load %arg1[%c0_16] : memref<1xf32, #tpu.memory_space<smem>>
      %cst_17 = arith.constant 1.000000e+00 : f32
      %17 = arith.divf %cst_17, %16 : f32
      %c0_18 = arith.constant 0 : index
      %c0_19 = arith.constant 0 : index
      %18 = vector.load %arg5[%c0_18, %c0_19] : memref<4x32xf32, #tpu.memory_space<vmem>>, vector<4x32xf32>
      %cst_20 = arith.constant 1.250000e-01 : f32
      %19 = vector.broadcast %cst_20 : f32 to vector<4x32xf32>
      %20 = arith.mulf %18, %19 : vector<4x32xf32>
      %21 = arith.mulf %20, %20 : vector<4x32xf32>
      %cst_21 = arith.constant dense<0.000000e+00> : vector<4xf32>
      %22 = vector.multi_reduction <add>, %21, %cst_21 [1] : vector<4x32xf32> to vector<4xf32>
      %23 = vector.shape_cast %22 : vector<4xf32> to vector<4x1xf32>
      %cst_22 = arith.constant 1.000000e-24 : f32
      %24 = vector.broadcast %cst_22 : f32 to vector<4x1xf32>
      %25 = arith.maximumf %23, %24 : vector<4x1xf32>
      %26 = math.rsqrt %25 : vector<4x1xf32>
      %27 = vector.broadcast %26 : vector<4x1xf32> to vector<4x32xf32>
      %28 = arith.mulf %20, %27 : vector<4x32xf32>
      %29 = vector.extract_strided_slice %28 {offsets = [0, 0], sizes = [2, 32], strides = [1, 1]} : vector<4x32xf32> to vector<2x32xf32>
      %30 = vector.extract_strided_slice %28 {offsets = [2, 0], sizes = [2, 32], strides = [1, 1]} : vector<4x32xf32> to vector<2x32xf32>
      %31 = arith.mulf %29, %30 : vector<2x32xf32>
      %32 = vector.shape_cast %31 : vector<2x32xf32> to vector<1x2x32xf32>
      %cst_23 = arith.constant dense<0.000000e+00> : vector<1xf32>
      %33 = vector.multi_reduction <add>, %32, %cst_23 [1, 2] : vector<1x2x32xf32> to vector<1xf32>
      %34 = vector.shape_cast %33 : vector<1xf32> to vector<1x1x1xf32>
      %35 = vector.extract %34[0, 0, 0] : f32 from vector<1x1x1xf32>
      %cst_24 = arith.constant dense<0.000000e+00> : vector<4x4xf32>
      %36 = tpu.matmul %28, %28, %cst_24 {dimension_numbers = #tpu.dot_dimension_numbers<[1], [1], [0], [0], [0, 0, 1, 0], [], []>} : vector<4x32xf32>, vector<4x32xf32>, vector<4x4xf32> -> vector<4x4xf32>
      %cst_25 = arith.constant 1.000000e+00 : f32
      %37 = vector.broadcast %cst_25 : f32 to vector<4x4xf32>
      %38 = arith.subf %36, %37 : vector<4x4xf32>
      %39 = vector.broadcast %17 : f32 to vector<4x4xf32>
      %40 = arith.mulf %38, %39 : vector<4x4xf32>
      %41 = math.exp %40 : vector<4x4xf32>
      %cst_26 = arith.constant dense<0.000000e+00> : vector<4xf32>
      %42 = vector.multi_reduction <add>, %41, %cst_26 [1] : vector<4x4xf32> to vector<4xf32>
      %43 = vector.shape_cast %42 : vector<4xf32> to vector<4x1xf32>
      %cst_27 = arith.constant 1.000000e+00 : f32
      %44 = vector.broadcast %cst_27 : f32 to vector<4x1xf32>
      %45 = arith.subf %43, %44 : vector<4x1xf32>
      %46 = math.log %45 : vector<4x1xf32>
      %47 = vector.shape_cast %46 : vector<4x1xf32> to vector<1x4x1xf32>
      %cst_28 = arith.constant dense<0.000000e+00> : vector<1xf32>
      %48 = vector.multi_reduction <add>, %47, %cst_28 [1, 2] : vector<1x4x1xf32> to vector<1xf32>
      %49 = vector.shape_cast %48 : vector<1xf32> to vector<1x1x1xf32>
      %50 = vector.extract %49[0, 0, 0] : f32 from vector<1x1x1xf32>
      %cst_29 = arith.constant 2.000000e+00 : f32
      %51 = arith.mulf %cst_29, %35 : f32
      %cst_30 = arith.constant 4.000000e+00 : f32
      %52 = arith.subf %cst_30, %51 : f32
      %53 = arith.mulf %17, %52 : f32
      %54 = arith.addf %50, %53 : f32
      %cst_31 = arith.constant 4.000000e+00 : f32
      %55 = arith.divf %54, %cst_31 : f32
      %c0_32 = arith.constant 0 : index
      %56 = memref.load %arg4[%c0_32] : memref<1xf32, #tpu.memory_space<smem>>
      memref.store %55, %arg4[%c0_32] : memref<1xf32, #tpu.memory_space<smem>>
    } else {
    }
    return
  }
  func.func @transform_0(%arg0: i32) -> i32 {
    %c0_i32 = arith.constant 0 : i32
    %c0_i32_0 = arith.constant 0 : i32
    return %c0_i32 : i32
  }
  func.func @transform_1(%arg0: i32) -> (i32, i32, i32) {
    %c0_i32 = arith.constant 0 : i32
    %c0_i32_0 = arith.constant 0 : i32
    %c0_i32_1 = arith.constant 0 : i32
    return %c0_i32, %arg0, %c0_i32_0 : i32, i32, i32
  }
  func.func @transform_2(%arg0: i32) -> (i32, i32, i32) {
    %c0_i32 = arith.constant 0 : i32
    %c0_i32_0 = arith.constant 0 : i32
    %c0_i32_1 = arith.constant 0 : i32
    return %c0_i32, %arg0, %c0_i32_0 : i32, i32, i32
  }
  func.func @transform_3(%arg0: i32) -> i32 {
    %c0_i32 = arith.constant 0 : i32
    %c0_i32_0 = arith.constant 0 : i32
    return %c0_i32 : i32
  }
}

</mosaic_0001>

<bundles_post_ra>
// kernel: tpu_custom_call.1
= control target key start
LH: loop header
LB: loop body
LE: loop exit
PB: predicated region body
PF: predicated region fallthrough
CT: control target
= control target key end

     0   :  { %9 = vsyncpa [#allocation5], 0  ;;  %s389_s0 = inlined_call_operand.<no memory space> [shape: f32[1], index: 0, kind: input, shape index: {}]   ;;  %s390_s1 = inlined_call_operand.hbm [shape: f32[2,8,32], index: 1, kind: input, shape index: {}]   ;;  %s391_s2 = inlined_call_operand.hbm [shape: f32[2,8,32], index: 2, kind: input, shape index: {}]   ;;  %s392_s3 = inlined_call_operand.hbm [shape: f32[1], index: 3, kind: output, shape index: {}]  }
   0x1   :  { %10 = vsyncpa [#allocation8], 0 }
   0x2   :  { %11 = vsyncpa [#allocation6], 0  ;;  %s335_s12 = smov [#allocation4]  }
   0x3   :  { %s19_s13 = sshll.u32 %s335_s12, 4  ;;  %s20_s13 = int_to_ptr.vmem [resolvable:$true] %s19_s13 }
   0x4   :  { %s289_s14 = scalar_lea.vmem %s20_s13, 256  ;;  %p294_p1 = scmp.lt.s32.totalorder %s20_s13, %s20_s13 }
   0x5   :  { %p290_p0 = scmp.ne.s32.totalorder %s20_s13, %s289_s14  ;;  %p295_p2 = scmp.lt.s32.totalorder %s289_s14, %s289_s14 }
   0x7   :  { %p296_p3 = por %p295_p2, %p294_p1 }
   0x9   :  { %p297_p4 = pnand %p296_p3, %p290_p0 }
   0xb   :  { %300 = shalt.err (!%p297_p4)
}
   0xc   :  { %s336_s15 = smov 128   ;;  %s337_s16 = smov 8  }
   0xd   :  { %25 = dma.hbm_to_vmem [thread:$0]  %s390_s1, 256, %s20_s13, [#allocation5], %s336_s15, %s336_s15, %s337_s16  }
   0xe   :  { %s338_s19 = smov [#allocation7]  }
   0xf   :  { %s31_s20 = sshll.u32 %s338_s19, 4  ;;  %s32_s20 = int_to_ptr.vmem [resolvable:$true] %s31_s20 }
  0x10   :  { %s309_s21 = scalar_lea.vmem %s32_s20, 256  ;;  %p314_p6 = scmp.lt.s32.totalorder %s32_s20, %s32_s20 }
  0x11   :  { %p310_p5 = scmp.ne.s32.totalorder %s32_s20, %s309_s21  ;;  %p315_p7 = scmp.lt.s32.totalorder %s309_s21, %s309_s21 }
  0x13   :  { %p316_p8 = por %p315_p7, %p314_p6 }
  0x15   :  { %p317_p9 = pnand %p316_p8, %p310_p5 }
  0x17   :  { %320 = shalt.err (!%p317_p9)
}
  0x18   :  { %37 = dma.hbm_to_vmem [thread:$0]  %s391_s2, 256, %s32_s20, [#allocation8], %s336_s15, %s336_s15, %s337_s16  }
  0x19   :  { %329 = dma.done.wait [#allocation5], 256  }
  0x1a   :  { %330 = vsyncadd [#allocation5], 4294967040 }
  0x1b   :  { %331 = dma.done.wait [#allocation8], 256  }
  0x1c   :  { %332 = vsyncadd [#allocation8], 4294967040  ;;  %vm48_vm0 = vcmask 257024   ;;  %v339_v0 = vmov 0.0   ;;  %vm53_vm1 = vcmask 261120   ;;  %v51_v1 = vld [vmem:[#allocation4] sm:$0xff]  ;;  %v103_v50 = vstv %s389_s0 }
  0x1d   :  { %49 = vst.msk [vmem:[#allocation2] sm:$0xf] %vm48_vm0, %v339_v0  ;;  %255 = vmatprep.subr.mxu0 %v339_v0  ;;  %v52_v2 = vld [vmem:[#allocation4 + $0x8] sm:$0xff]  ;;  %v77_v3 = vld [vmem:[#allocation7] sm:$0xff]  ;;  %v54_v4 = vsel %vm53_vm1, %v51_v1, 0.0  ;;  %v78_v8 = vld [vmem:[#allocation7 + $0x8] sm:$0xff] }
  0x1e   :  { %v61_v5 = vsel %vm53_vm1, %v52_v2, 0.0  ;;  %v55_v6 = vrot.slane %v54_v4, 4  ;;  %v79_v9 = vsel %vm53_vm1, %v77_v3, 0.0  ;;  %v86_v11 = vsel %vm53_vm1, %v78_v8, 0.0  ;;  %s341_s4 = smov [#allocation9]  }
  0x1f   :  { %v62_v7 = vrot.slane %v61_v5, 4  ;;  %v80_v10 = vrot.slane %v79_v9, 4  ;;  %v87_v14 = vrot.slane %v86_v11, 4  ;;  %vm70_vm2 = vcmask 1041409  }
  0x20   :  { %v56_v12 = vadd.f32 %v55_v6, %v54_v4  ;;  %vm74_vm3 = vcmask 254976   ;;  %vm340_vm4 = vmmov 0   ;;  %vm207_vm5 = vcmask 27648  }
  0x21   :  { %v63_v13 = vadd.f32 %v62_v7, %v61_v5  ;;  %v81_v15 = vadd.f32 %v80_v10, %v79_v9  ;;  %v88_v18 = vadd.f32 %v87_v14, %v86_v11  ;;  %257 = vmatprep.mubr.msk.f32.mxu0 %vm340_vm4, %v339_v0  ;;  %vm214_vm6 = vcmask 3072  }
  0x22   :  { %v57_v16 = vrot.slane %v56_v12, 2 }
  0x23   :  { %v64_v17 = vrot.slane %v63_v13, 2  ;;  %v82_v19 = vrot.slane %v81_v15, 2  ;;  %v89_v22 = vrot.slane %v88_v18, 2 }
  0x24   :  { %v58_v20 = vadd.f32 %v57_v16, %v56_v12  ;;  %v50_v28 = vld [vmem:[#allocation2] sm:$0x3]  ;;  %v76_v34 = vld [vmem:[#allocation2 + $0x2] sm:$0x3] }
  0x25   :  { %v65_v21 = vadd.f32 %v64_v17, %v63_v13  ;;  %v83_v23 = vadd.f32 %v82_v19, %v81_v15  ;;  %v90_v26 = vadd.f32 %v89_v22, %v88_v18 }
  0x26   :  { %v59_v24 = vrot.slane %v58_v20, 1 }
  0x27   :  { %v66_v25 = vrot.slane %v65_v21, 1  ;;  %v84_v27 = vrot.slane %v83_v23, 1  ;;  %v91_v31 = vrot.slane %v90_v26, 1 }
  0x28   :  { %v60_v29 = vadd.f32 %v59_v24, %v58_v20 }
  0x29   :  { %v67_v30 = vadd.f32 %v66_v25, %v65_v21  ;;  %v85_v32 = vadd.f32 %v84_v27, %v83_v23  ;;  %v92_v35 = vadd.f32 %v91_v31, %v90_v26 }
  0x2b   :  { %v71_v33 = vsel %vm70_vm2, %v67_v30, %v60_v29  ;;  %v95_v37 = vsel %vm70_vm2, %v92_v35, %v85_v32 }
  0x2c   :  { %v73_v36 = vadd.f32 %v71_v33, %v50_v28  ;;  %v97_v38 = vadd.f32 %v95_v37, %v76_v34 }
  0x2e   :  { %75 = vst.msk [vmem:[#allocation2] sm:$0x3] %vm74_vm3, %v73_v36  ;;  %98 = vst.msk [vmem:[#allocation2 + $0x2] sm:$0x3] %vm74_vm3, %v97_v38 }
  0x35   :  { %v106_v39 = vld [vmem:[#allocation2] sm:$0xf] }
  0x36   :  { %v107_v40 = vmul.f32 0.125, %v106_v39 }
  0x38   :  { %v108_v41 = vmul.f32 %v107_v40, %v107_v40 }
  0x3a   :  { %v110_v42 = vsel %vm48_vm0, %v108_v41, 0.0 }
  0x3b   :  { %111 = vadd.xlane.f32.xlu0 %v110_v42 }
  0xc4   :  { %v112_v43 = vpop.xlane.xlu0 %111 }
  0xc5   :  { %v113_v44 = vmax.f32 %v112_v43, 1e-24 }
  0xc7   :  { %273 = vrsqrt.f32 %v113_v44 }
  0xc8   :  { %275 = vrcp.f32 %v103_v50 }
  0xd4   :  { %v274_v45 = vpop.eup %273 }
  0xd5   :  { %v115_v46 = vmul.f32 %v274_v45, %v107_v40  ;;  %v276_v51 = vpop.eup %275 }
  0xd6   :  { %260 = vpush %v276_v51 }
  0xd7   :  { %256 = vmatpush3.xpose.msk.msra.mxu0 %vm53_vm1, %v115_v46  ;;  %v117_v47 = vrot.slane %v115_v46, 2 }
  0xd9   :  { %v119_v48 = vmul.f32 %v117_v47, %v115_v46 }
  0xda   :  { %258 = vmatmul.mubr.msk.f32.vlgmr.msra.gmra.mxu0 %vm53_vm1, %v115_v46 }
  0xdb   :  { %v120_v49 = vsel %vm74_vm3, %v119_v48, 0.0 }
  0xdc   :  { %121 = vadd.xlane.f32.xlu1 %v120_v49 }
 0x107   :  { %s382_s24 = spop %260 }
 0x108   :  { %v203_v60 = vstv %s382_s24 }
 0x165   :  { %v122_v52 = vpop.xlane.xlu1 %121 }
 0x166   :  { %v123_v53 = vrot.slane %v122_v52, 4 }
 0x168   :  { %v124_v54 = vadd.f32 %v123_v53, %v122_v52 }
 0x16a   :  { %v125_v55 = vrot.slane %v124_v54, 2 }
 0x16c   :  { %v126_v56 = vadd.f32 %v125_v55, %v124_v54 }
 0x16e   :  { %v127_v57 = vrot.slane %v126_v56, 1 }
 0x170   :  { %v128_v58 = vadd.f32 %v127_v57, %v126_v56 }
 0x172   :  { %262 = vpush %v128_v58 }
 0x19a   :  { %v198_v59 = vpop.f32.mrf.mxu0 }
 0x19b   :  { %v251_v61 = vadd.f32 -1.0, %v198_v59 }
 0x19c   :  { %v259_v62 = vpop.f32.mrf.mxu0 }
 0x19d   :  { %v204_v63 = vmul.f32 %v251_v61, %v203_v60 }
 0x19f   :  { %v205_v0 = vmul.f32 1.442695, %v204_v63 }
 0x1a1   :  { %277 = vpow2.f32 %v205_v0 }
 0x1a3   :  { %s263_s0 = spop %262 }
 0x1a4   :  { %s225_s25 = smul.f32 2.0, %s263_s0 }
 0x1a6   :  { %s226_s26 = ssub.f32 4.0, %s225_s25 }
 0x1a8   :  { %s227_s27 = smul.f32 %s382_s24, %s226_s26 }
 0x1ae   :  { %v278_v1 = vpop.eup %277 }
 0x1af   :  { %v208_v2 = vsel %vm207_vm5, %v278_v1, 0.0 }
 0x1b0   :  { %209 = vadd.xlane.f32.xlu0 %v208_v2 }
 0x239   :  { %v210_v3 = vpop.xlane.xlu0 %209 }
 0x23a   :  { %v252_v4 = vadd.f32 -1.0, %v210_v3 }
 0x23c   :  { %279 = vlog2.f32 %v252_v4 }
 0x249   :  { %v280_v5 = vpop.eup %279 }
 0x24a   :  { %v213_v6 = vmul.f32 0.6931472, %v280_v5 }
 0x24c   :  { %v215_v7 = vsel %vm214_vm6, %v213_v6, 0.0 }
 0x24d   :  { %216 = vadd.xlane.f32.xlu1 %v215_v7 }
 0x2d6   :  { %v217_v8 = vpop.xlane.xlu1 %216 }
 0x2d7   :  { %v218_v9 = vrot.slane %v217_v8, 4 }
 0x2d9   :  { %v219_v10 = vadd.f32 %v218_v9, %v217_v8 }
 0x2db   :  { %v220_v11 = vrot.slane %v219_v10, 2 }
 0x2dd   :  { %v221_v12 = vadd.f32 %v220_v11, %v219_v10 }
 0x2df   :  { %v222_v13 = vrot.slane %v221_v12, 1 }
 0x2e1   :  { %v223_v14 = vadd.f32 %v222_v13, %v221_v12 }
 0x2e3   :  { %264 = vpush %v223_v14 }
 0x314   :  { %s265_s28 = spop %264 }
 0x315   :  { %s228_s29 = sadd.f32 %s265_s28, %s227_s27 }
 0x317   :  { %s231_s30 = smul.f32 0.25, %s228_s29 }
 0x319   :  { %233 = sst [smem:[#allocation9]] %s231_s30 }
 0x31a   :  { %241 = dma.smem_to_hbm %s341_s4, 16, %s392_s3, [#allocation6]  }
 0x31b   :  { %333 = dma.done.wait [#allocation6], 16  }
 0x31c   :  { %334 = vsyncadd [#allocation6], 4294967280 }
 0x31d   :  { %245 = sfence }
 0x31e   :  { %246 = vsyncpa [#allocation5], 1 }
 0x31f   :  { %247 = vsyncpa [#allocation8], 1 }
 0x320   :  { %248 = vsyncpa [#allocation6], 1 }

</bundles_post_ra>
